<compile_context>
chip_gen: v6e
topology: v6e:2x2x1
jax: 0.10.0
libtpu: 0.0.40
codegen_flags: <defaults>
</compile_context>

<pallas_src>
import jax
import jax.numpy as jnp
from jax.experimental import pallas as pl
from jax.experimental.pallas import tpu as pltpu


def _round_up(x, m):
    return (x + m - 1) // m * m


def _cnn_text_kernel(x_ref, w_ref, b_ref, o_ref):
    # x_ref: (TILE_M, KD_pad) bf16; w_ref: (KD_pad, Co_pad) bf16
    # b_ref: (1, Co_pad) f32;      o_ref: (TILE_M, Co_pad) f32
    acc = jnp.dot(x_ref[...], w_ref[...], preferred_element_type=jnp.float32)
    # Conv bias + ReLU epilogue in f32; lane-dense (Co_pad % 128 == 0) store.
    o_ref[...] = jnp.maximum(acc + b_ref[...], 0.0).astype(o_ref.dtype)


def cnn_text_forward(x, conv_w, conv_b, *, tile_m=256):
    """x: (N, S, D) float32; conv_w: (Co, 1, K, D); conv_b: (Co,)."""
    N, S, D = x.shape
    Co, _, K, Dk = conv_w.shape
    assert Dk == D, "conv kernel width must equal embed_dim"
    T = S - K + 1                      # == 1 for CNN_Text (K = sent_length)
    M = N * T
    KD = K * D

    # --- glue: im2col + flatten ---
    if T == 1:
        x_col = x.reshape(N, KD)       # free reshape, no gather
    else:
        # TODO(synk): for T > 1 do the sliding-window im2col inside the kernel
        # with pl.ds over an (S, D) VMEM block instead of this HBM gather.
        idx = jnp.arange(T)[:, None] + jnp.arange(K)[None, :]
        x_col = x[:, idx, :].reshape(M, KD)
    w_flat = conv_w.reshape(Co, KD).T  # (KD, Co)
    b_flat = conv_b.reshape(1, Co)

    # --- lane-dense / MXU-friendly padding ---
    Co_pad = _round_up(Co, 128)        # unmasked vst, full MXU result columns
    KD_pad = _round_up(KD, 128)
    TILE_M = tile_m if M >= tile_m else _round_up(M, 8)
    M_pad = _round_up(M, TILE_M)

    # bf16 MXU operands (halves HBM traffic, doubles MXU throughput); padded
    # rows/columns are zero so they do not perturb the dot product.
    x_p = jnp.zeros((M_pad, KD_pad), jnp.bfloat16).at[:M, :KD].set(
        x_col.astype(jnp.bfloat16))
    w_p = jnp.zeros((KD_pad, Co_pad), jnp.bfloat16).at[:KD, :Co].set(
        w_flat.astype(jnp.bfloat16))
    b_p = jnp.zeros((1, Co_pad), jnp.float32).at[:, :Co].set(
        b_flat.astype(jnp.float32))

    grid_m = M_pad // TILE_M
    cost = pl.CostEstimate(
        flops=2 * M_pad * KD_pad * Co_pad,
        transcendentals=0,
        bytes_accessed=(x_p.size * 2 + w_p.size * 2 + b_p.size * 4
                        + M_pad * Co_pad * 4),
    )

    out = pl.pallas_call(
        _cnn_text_kernel,
        out_shape=jax.ShapeDtypeStruct((M_pad, Co_pad), jnp.float32),
        grid=(grid_m,),
        in_specs=[
            pl.BlockSpec((TILE_M, KD_pad), lambda i: (i, 0)),
            pl.BlockSpec((KD_pad, Co_pad), lambda i: (0, 0)),
            pl.BlockSpec((1, Co_pad), lambda i: (0, 0)),
        ],
        out_specs=pl.BlockSpec((TILE_M, Co_pad), lambda i: (i, 0)),
        compiler_params=pltpu.CompilerParams(
            dimension_semantics=("parallel",)),
        cost_estimate=cost,
    )(x_p, w_p, b_p)

    conv = out[:M, :Co]                # drop zero-padded rows / channels
    if T == 1:
        pooled = conv                  # max over a length-1 axis is identity
    else:
        pooled = jnp.max(conv.reshape(N, T, Co), axis=1)

    # Dropout: inference mode => identity.
    # TODO(synk): training-mode stochastic dropout not implemented (pltpu.prng_*).
    return pooled


def _reference_forward(x, conv_w, conv_b):
    """Pure-JAX f32 reference following the PyTorch conv formula directly."""
    N, S, D = x.shape
    Co, _, K, _ = conv_w.shape
    T = S - K + 1
    outs = []
    for t in range(T):
        win = x[:, t:t + K, :]                               # (N, K, D)
        outs.append(jnp.einsum('nkd,okd->no', win, conv_w[:, 0]) + conv_b)
    conv = jnp.stack(outs, axis=-1)                          # (N, Co, T)
    conv = jax.nn.relu(conv)
    return jnp.max(conv, axis=-1)                            # (N, Co)


if __name__ == "__main__":
    # Module-consistent small shapes: embed_dim=32, sent_length=8, batch=2.
    embed_dim = 32
    sent_length = 8
    batch = 2
    Co = embed_dim * 2          # 64
    K = sent_length             # sent_length * +1 == sent_length

    key = jax.random.PRNGKey(0)
    kx, kw, kb = jax.random.split(key, 3)
    x = jax.random.normal(kx, (batch, sent_length, embed_dim), jnp.float32)
    conv_w = 0.05 * jax.random.normal(kw, (Co, 1, K, embed_dim), jnp.float32)
    conv_b = 0.05 * jax.random.normal(kb, (Co,), jnp.float32)

    out = cnn_text_forward(x, conv_w, conv_b)
    out = jax.block_until_ready(out)

    ref = _reference_forward(x, conv_w, conv_b)
    assert out.shape == (batch, Co), out.shape
    # bf16 MXU operands with f32 accumulation => ~1e-2-scale tolerance.
    assert jnp.allclose(out, ref, atol=3e-2, rtol=3e-2), (
        f"max abs err = {jnp.max(jnp.abs(out - ref))}")

    print("KERNEL_OK")
</pallas_src>

<mosaic_0001>
module attributes {stable_mosaic.version = 11 : i64} {
  func.func @_cnn_text_kernel(%arg0: i32, %arg1: memref<8x256xbf16, #tpu.memory_space<vmem>>, %arg2: memref<256x128xbf16, #tpu.memory_space<vmem>>, %arg3: memref<1x128xf32, #tpu.memory_space<vmem>>, %arg4: memref<8x128xf32, #tpu.memory_space<vmem>>) attributes {dimension_semantics = [#tpu.dimension_semantics<parallel>], iteration_bounds = array<i64: 1>, scalar_prefetch = 0 : i64, scratch_operands = 0 : i64, tpu.core_type = #tpu.core_type<tc>, window_params = [{transform_indices = @transform_0, window_bounds = array<i64: 8, 256>}, {pipeline_mode = #tpu.pipeline_mode<synchronous>, transform_indices = @transform_1, window_bounds = array<i64: 256, 128>}, {pipeline_mode = #tpu.pipeline_mode<synchronous>, transform_indices = @transform_2, window_bounds = array<i64: 1, 128>}, {transform_indices = @transform_3, window_bounds = array<i64: 8, 128>}]} {
    %c0 = arith.constant 0 : index
    %c0_0 = arith.constant 0 : index
    %0 = vector.load %arg1[%c0, %c0_0] : memref<8x256xbf16, #tpu.memory_space<vmem>>, vector<8x256xbf16>
    %c0_1 = arith.constant 0 : index
    %c0_2 = arith.constant 0 : index
    %1 = vector.load %arg2[%c0_1, %c0_2] : memref<256x128xbf16, #tpu.memory_space<vmem>>, vector<256x128xbf16>
    %cst = arith.constant dense<0.000000e+00> : vector<8x128xf32>
    %2 = tpu.matmul %0, %1, %cst {dimension_numbers = #tpu.dot_dimension_numbers<[1], [0], [0], [1], [0, 0, 1, 1], [], []>} : vector<8x256xbf16>, vector<256x128xbf16>, vector<8x128xf32> -> vector<8x128xf32>
    %c0_3 = arith.constant 0 : index
    %c0_4 = arith.constant 0 : index
    %3 = vector.load %arg3[%c0_3, %c0_4] : memref<1x128xf32, #tpu.memory_space<vmem>>, vector<1x128xf32>
    %4 = vector.broadcast %3 : vector<1x128xf32> to vector<8x128xf32>
    %5 = arith.addf %2, %4 : vector<8x128xf32>
    %cst_5 = arith.constant 0.000000e+00 : f32
    %6 = vector.broadcast %cst_5 : f32 to vector<8x128xf32>
    %7 = arith.maximumf %5, %6 : vector<8x128xf32>
    %c0_6 = arith.constant 0 : index
    %c0_7 = arith.constant 0 : index
    %8 = vector.load %arg4[%c0_6, %c0_7] : memref<8x128xf32, #tpu.memory_space<vmem>>, vector<8x128xf32>
    tpu.vector_store %arg4[%c0_6, %c0_7], %7 {strides = array<i32>} : memref<8x128xf32, #tpu.memory_space<vmem>>, vector<8x128xf32>,
    return
  }
  func.func @transform_0(%arg0: i32) -> (i32, i32) {
    %c0_i32 = arith.constant 0 : i32
    %c0_i32_0 = arith.constant 0 : i32
    return %arg0, %c0_i32 : i32, i32
  }
  func.func @transform_1(%arg0: i32) -> (i32, i32) {
    %c0_i32 = arith.constant 0 : i32
    %c0_i32_0 = arith.constant 0 : i32
    %c0_i32_1 = arith.constant 0 : i32
    return %c0_i32, %c0_i32_0 : i32, i32
  }
  func.func @transform_2(%arg0: i32) -> (i32, i32) {
    %c0_i32 = arith.constant 0 : i32
    %c0_i32_0 = arith.constant 0 : i32
    %c0_i32_1 = arith.constant 0 : i32
    return %c0_i32, %c0_i32_0 : i32, i32
  }
  func.func @transform_3(%arg0: i32) -> (i32, i32) {
    %c0_i32 = arith.constant 0 : i32
    %c0_i32_0 = arith.constant 0 : i32
    return %arg0, %c0_i32 : i32, i32
  }
}

</mosaic_0001>

<bundles_post_ra>
// kernel: tpu_custom_call.1
= control target key start
LH: loop header
LB: loop body
LE: loop exit
PB: predicated region body
PF: predicated region fallthrough
CT: control target
= control target key end

     0   :  { %8 = vsyncpa [#allocation3], 0  ;;  %s410_s0 = inlined_call_operand.hbm [shape: bf16[8,256], index: 0, kind: input, shape index: {}]   ;;  %s411_s1 = inlined_call_operand.hbm [shape: bf16[256,128], index: 1, kind: input, shape index: {}]   ;;  %s412_s2 = inlined_call_operand.vmem [shape: f32[1,128], index: 2, kind: input, shape index: {}]   ;;  %s413_s3 = inlined_call_operand.hbm [shape: f32[8,128], index: 3, kind: output, shape index: {}]  }
   0x1   :  { %9 = vsyncpa [#allocation6], 0 }
   0x2   :  { %10 = vsyncpa [#allocation4], 0  ;;  %s373_s12 = smov [#allocation2]   ;;  %s374_s14 = smov [#allocation5]  }
   0x3   :  { %s17_s13 = sshll.u32 %s373_s12, 4  ;;  %s26_s15 = sshll.u32 %s374_s14, 4  ;;  %s18_s13 = int_to_ptr.vmem [resolvable:$true] %s17_s13  ;;  %s27_s15 = int_to_ptr.vmem [resolvable:$true] %s26_s15 }
   0x4   :  { %s315_s16 = scalar_lea.vmem %s18_s13, 128  ;;  %p320_p1 = scmp.lt.s32.totalorder %s18_s13, %s18_s13 }
   0x5   :  { %p316_p0 = scmp.ne.s32.totalorder %s18_s13, %s315_s16  ;;  %p321_p2 = scmp.lt.s32.totalorder %s315_s16, %s315_s16 }
   0x7   :  { %p322_p3 = por %p321_p2, %p320_p1 }
   0x9   :  { %p323_p4 = pnand %p322_p3, %p316_p0 }
   0xb   :  { %326 = shalt.err (!%p323_p4)
}
   0xc   :  { %20 = dma.hbm_to_vmem [thread:$0]  %s410_s0, 128, %s18_s13, [#allocation3]  }
   0xd   :  { %s335_s19 = scalar_lea.vmem %s27_s15, 2048  ;;  %p340_p6 = scmp.lt.s32.totalorder %s27_s15, %s27_s15 }
   0xe   :  { %p336_p5 = scmp.ne.s32.totalorder %s27_s15, %s335_s19  ;;  %p341_p7 = scmp.lt.s32.totalorder %s335_s19, %s335_s19 }
  0x10   :  { %p342_p8 = por %p341_p7, %p340_p6 }
  0x12   :  { %p343_p9 = pnand %p342_p8, %p336_p5 }
  0x14   :  { %346 = shalt.err (!%p343_p9)
}
  0x15   :  { %s375_s20 = smov 64   ;;  %s376_s21 = smov 4  }
  0x16   :  { %32 = dma.hbm_to_vmem [thread:$0]  %s411_s1, 2048, %s27_s15, [#allocation6], %s375_s20, %s375_s20, %s376_s21  }
  0x17   :  { %367 = dma.done.wait [#allocation3], 128  }
  0x18   :  { %368 = vsyncadd [#allocation3], 4294967168 }
  0x19   :  { %369 = dma.done.wait [#allocation6], 2048  }
  0x1a   :  { %370 = vsyncadd [#allocation6], 4294965248  ;;  %v289_v0 = vld [vmem:[#allocation5 + $0x78] sm:$0xff]   ;;  %v291_v2 = vld [vmem:[#allocation5 + $0x70] sm:$0xff]   ;;  %s377_s24 = smov [#allocation7]  }
  0x1b   :  { %v290_v1 = vld [vmem:[#allocation5 + $0x38] sm:$0xff]   ;;  %262 = vmatprep.subr.bf16.mxu0 %v289_v0  ;;  %v292_v3 = vld [vmem:[#allocation5 + $0x30] sm:$0xff]   ;;  %v293_v4 = vld [vmem:[#allocation5 + $0x68] sm:$0xff]   ;;  %s233_s25 = sshll.u32 %s377_s24, 4  ;;  %s234_s25 = int_to_ptr.vmem [resolvable:$true] %s233_s25 }
  0x1c   :  { %263 = vmatpush3.bf16.msra.mxu0 %v290_v1  ;;  %v294_v5 = vld [vmem:[#allocation5 + $0x28] sm:$0xff]   ;;  %v295_v6 = vld [vmem:[#allocation5 + $0x60] sm:$0xff]   ;;  %v297_v8 = vld [vmem:[#allocation5 + $0x58] sm:$0xff]   ;;  %s347_s26 = scalar_lea.vmem %s234_s25, 128  ;;  %p352_p11 = scmp.lt.s32.totalorder %s234_s25, %s234_s25 }
  0x1d   :  { %264 = vmatprep.subr.bf16.mxu0 %v291_v2  ;;  %v296_v7 = vld [vmem:[#allocation5 + $0x20] sm:$0xff]   ;;  %v298_v9 = vld [vmem:[#allocation5 + $0x18] sm:$0xff]   ;;  %v299_v10 = vld [vmem:[#allocation5 + $0x50] sm:$0xff]   ;;  %p348_p10 = scmp.ne.s32.totalorder %s234_s25, %s347_s26  ;;  %p353_p12 = scmp.lt.s32.totalorder %s347_s26, %s347_s26 }
  0x1e   :  { %v42_v11 = vld [vmem:[#allocation2] sm:$0xff]  ;;  %v300_v13 = vld [vmem:[#allocation5 + $0x10] sm:$0xff]   ;;  %v301_v14 = vld [vmem:[#allocation5 + $0x48] sm:$0xff]  }
  0x1f   :  { %v245_v12 = vcombine.high %v42_v11, %v42_v11  ;;  %v302_v15 = vld [vmem:[#allocation5 + $0x8] sm:$0xff]   ;;  %v303_v16 = vld [vmem:[#allocation5 + $0x40] sm:$0xff]   ;;  %v244_v18 = vcombine.low %v42_v11, %v42_v11  ;;  %v243_v20 = vld [vmem:[%s412_s2] ss:$0 sm:$0xff]  ;;  %p354_p13 = por %p353_p12, %p352_p11 }
  0x20   :  { %265 = vmatpush3.bf16.msra.mxu0 %v292_v3  ;;  %v304_v17 = vld [vmem:[#allocation5] sm:$0xff]  }
  0x21   :  { %266 = vmatprep.subr.bf16.mxu0 %v293_v4  ;;  %217 = vmatprep.mubr.bf16.mxu0 %v245_v12  ;;  %p355_p0 = pnand %p354_p13, %p348_p10 }
  0x24   :  { %267 = vmatpush3.bf16.msra.mxu0 %v294_v5 }
  0x25   :  { %268 = vmatprep.subr.bf16.mxu0 %v295_v6 }
  0x28   :  { %269 = vmatpush3.bf16.msra.mxu0 %v296_v7 }
  0x29   :  { %270 = vmatprep.subr.bf16.mxu0 %v297_v8 }
  0x2c   :  { %271 = vmatpush3.bf16.msra.mxu0 %v298_v9 }
  0x2d   :  { %272 = vmatprep.subr.bf16.mxu0 %v299_v10 }
  0x30   :  { %273 = vmatpush3.bf16.msra.mxu0 %v300_v13 }
  0x31   :  { %274 = vmatprep.subr.bf16.mxu0 %v301_v14 }
  0x34   :  { %275 = vmatpush3.bf16.msra.mxu0 %v302_v15 }
  0x35   :  { %276 = vmatprep.subr.bf16.mxu0 %v303_v16 }
  0x38   :  { %277 = vmatpush3.bf16.msra.mxu0 %v304_v17 }
  0x3b   :  { %218 = vmatmul.mubr.bf16.vlgmr.msra.gmra.mxu0 %v244_v18 }
  0xfb   :  { %v278_v19 = vpop.f32.mrf.mxu0 }
  0xfd   :  { %v279_v21 = vpop.f32.mrf.mxu0 }
  0xfe   :  { %v280_v22 = vadd.f32 %v279_v21, %v278_v19 }
  0xff   :  { %v281_v23 = vpop.f32.mrf.mxu0 }
 0x100   :  { %v220_v24 = vadd.f32 %v280_v22, %v243_v20 }
 0x101   :  { %v282_v25 = vpop.f32.mrf.mxu0 }
 0x102   :  { %v225_v26 = vmax.f32 %v220_v24, 0.0 }
 0x104   :  { %226 = vst [vmem:[#allocation7] sm:$0xff] %v225_v26 }
 0x105   :  { %358 = shalt.err (!%p355_p0)
}
 0x106   :  { %236 = dma.vmem_to_hbm [thread:$0]  %s234_s25, 128, %s413_s3, [#allocation4]  }
 0x107   :  { %371 = dma.done.wait [#allocation4], 128  }
 0x108   :  { %372 = vsyncadd [#allocation4], 4294967168 }
 0x109   :  { %240 = vsyncpa [#allocation3], 1 }
 0x10a   :  { %241 = vsyncpa [#allocation6], 1 }
 0x10b   :  { %242 = vsyncpa [#allocation4], 1 }

</bundles_post_ra>
